<compile_context>
chip_gen: v5e
topology: v5e:2x2
jax: 0.10.0
libtpu: 0.0.40
codegen_flags: <defaults>
</compile_context>

<pallas_src>
import functools
import math

import jax
import jax.numpy as jnp
from jax import lax
from jax.experimental import pallas as pl
from jax.experimental.pallas import tpu as pltpu


_VMEM_LIMIT_BYTES = 32 * 1024 * 1024   # safe on v5e/v6e (128 MiB phys) and v7x (64 MiB phys)


# ------------------------- tiling helpers -------------------------

def _round_up(x, m):
    return ((x + m - 1) // m) * m


def _tile_dim(dim, preferred, align):
    """Return (tile, padded_dim).

    Prefers (a) the full dim when it is small (always layout-legal, never padded) and
    (b) tiles that divide `dim` exactly so the array never needs a wrapper-side pad;
    falls back to aligned-tile + padding only when no aligned divisor exists.
    """
    if dim <= preferred:
        return dim, dim
    t = (preferred // align) * align
    while t >= align:
        if dim % t == 0:
            return t, dim
        t -= align
    t = max((preferred // align) * align, align)
    return t, _round_up(dim, t)


def _split_for_megacore(t0, t1, n_blocks, align0=8, align1=128):
    """If the parallel grid has a single block, halve one axis so both v7x TCs get work."""
    if n_blocks == 1:
        if t0 >= 16 and (t0 // 2) % align0 == 0:
            t0 //= 2
        elif t1 >= 2 * align1 and (t1 // 2) % align1 == 0:
            t1 //= 2
    return t0, t1


# ------------------------- Pallas kernels -------------------------

def _linear_kernel_fused(x_ref, w_ref, b_ref, o_ref, *, compute_dtype):
    """f32-output path: accumulate directly into the resident output block (no scratch)."""
    k = pl.program_id(2)
    x = x_ref[...]
    w = w_ref[...]
    if compute_dtype is not None:
        x = x.astype(compute_dtype)
        w = w.astype(compute_dtype)
    # W tile is in native (N, K) layout: contract dim 1 of both operands (x @ W.T).
    part = lax.dot_general(
        x, w, dimension_numbers=(((1,), (1,)), ((), ())),
        preferred_element_type=jnp.float32)

    @pl.when(k == 0)
    def _():
        o_ref[...] = part + b_ref[...].astype(jnp.float32)   # bias broadcast (1,tn)->(tm,tn)

    @pl.when(k != 0)
    def _():
        o_ref[...] += part


def _linear_kernel_acc(x_ref, w_ref, b_ref, o_ref, acc_ref, *, compute_dtype):
    """Generic-output path: f32 VMEM accumulator, cast on the final K step."""
    k = pl.program_id(2)

    @pl.when(k == 0)
    def _():
        acc_ref[...] = jnp.zeros_like(acc_ref)

    x = x_ref[...]
    w = w_ref[...]
    if compute_dtype is not None:
        x = x.astype(compute_dtype)
        w = w.astype(compute_dtype)
    acc_ref[...] += lax.dot_general(
        x, w, dimension_numbers=(((1,), (1,)), ((), ())),
        preferred_element_type=jnp.float32)

    @pl.when(k == pl.num_programs(2) - 1)
    def _():
        o_ref[...] = (acc_ref[...] + b_ref[...].astype(jnp.float32)).astype(o_ref.dtype)


def _prep_kernel(w_ref, m_ref):
    """Fused |w| / nonzero-mask / +inf substitution (single streaming read of W)."""
    w = w_ref[...]
    m_ref[...] = jnp.where(w != 0, jnp.abs(w).astype(jnp.float32), jnp.float32(jnp.inf))


def _prune_kernel(thresh_ref, w_ref, o_ref):
    """Zero every weight with |w| <= threshold (zeros stay zero; +inf prunes all nonzeros)."""
    t = thresh_ref[0]
    w = w_ref[...]
    o_ref[...] = jnp.where(jnp.abs(w).astype(jnp.float32) > t, w, jnp.zeros_like(w))


# ------------------------- wrappers -------------------------

def sparse_layer_forward(x, w, b, *, tm_max=256, tn_max=1024, tk_max=1024,
                         compute_dtype=None):
    """Dense train-mode forward of SparseLayer: x @ W.T + b, tiled Pallas matmul.

    `compute_dtype=jnp.bfloat16` casts the matmul operands in-kernel (f32 accumulation kept)
    for the bf16-native MXUs on v6e/v7x; default None keeps exact f32 semantics.
    """
    batch, in_f = x.shape
    out_f, in_f_w = w.shape
    assert in_f == in_f_w, "input feature mismatch"
    out_dtype = x.dtype

    tm, mp = _tile_dim(batch, tm_max, 8)
    tn, np_ = _tile_dim(out_f, tn_max, 128)
    tk, kp = _tile_dim(in_f, tk_max, 128)
    tm, tn = _split_for_megacore(tm, tn, (mp // tm) * (np_ // tn))

    # Only x / bias are padded in the common case; W keeps its native (N, K) layout and the
    # divisor-preferring tiling keeps it pad-free for typical layer sizes.
    xp = x if (mp, kp) == x.shape else jnp.pad(x, ((0, mp - batch), (0, kp - in_f)))
    wp = w if (np_, kp) == w.shape else jnp.pad(w, ((0, np_ - out_f), (0, kp - in_f)))
    b2 = b.reshape(1, out_f)
    b2p = b2 if np_ == out_f else jnp.pad(b2, ((0, 0), (0, np_ - out_f)))

    grid = (mp // tm, np_ // tn, kp // tk)
    fused = (out_dtype == jnp.float32)
    kernel = functools.partial(
        _linear_kernel_fused if fused else _linear_kernel_acc, compute_dtype=compute_dtype)
    scratch = [] if fused else [pltpu.VMEM((tm, tn), jnp.float32)]

    # TODO(synk): if profiling with large K tiles shows exposed W-tile DMA, add
    # pipeline_mode=pl.Buffered(3) to the W BlockSpec (sweep 2 vs 3).
    out = pl.pallas_call(
        kernel,
        out_shape=jax.ShapeDtypeStruct((mp, np_), out_dtype),
        grid_spec=pltpu.PrefetchScalarGridSpec(
            num_scalar_prefetch=0,
            grid=grid,
            in_specs=[
                pl.BlockSpec((tm, tk), lambda i, j, k: (i, k)),   # x tile
                pl.BlockSpec((tn, tk), lambda i, j, k: (j, k)),   # W tile, native (N, K)
                pl.BlockSpec((1, tn), lambda i, j, k: (0, j)),    # bias tile
            ],
            out_specs=pl.BlockSpec((tm, tn), lambda i, j, k: (i, j)),
            scratch_shapes=scratch,
        ),
        compiler_params=pltpu.CompilerParams(
            dimension_semantics=("parallel", "parallel", "arbitrary"),
            vmem_limit_bytes=_VMEM_LIMIT_BYTES),
    )(xp, wp, b2p)

    if (mp, np_) != (batch, out_f):
        out = out[:batch, :out_f]
    return out


def prune_weights(w, k, *, tr_max=512, tc_max=1024):
    """Functional equivalent of SparseLayer.prune_smallest_values().

    One fused Pallas pass builds the (+inf-masked) nonzero magnitudes, lax.top_k picks the
    n_prune-th smallest, and a tiled Pallas pass applies the threshold. No separate
    nonzero-count pass: with zeros mapped to +inf, a +inf threshold reproduces PyTorch's
    "not enough nonzero values -> zero all nonzeros" branch automatically.
    """
    out_f, in_f = w.shape
    n_prune = math.floor(k * in_f * out_f)          # static python int

    tr, rp = _tile_dim(out_f, tr_max, 8)
    tc, cp = _tile_dim(in_f, tc_max, 128)
    tr, tc = _split_for_megacore(tr, tc, (rp // tr) * (cp // tc))
    wp = w if (rp, cp) == w.shape else jnp.pad(w, ((0, rp - out_f), (0, cp - in_f)))

    grid = (rp // tr, cp // tc)
    elem_params = pltpu.CompilerParams(
        dimension_semantics=("parallel", "parallel"),
        vmem_limit_bytes=_VMEM_LIMIT_BYTES)
    tile_spec = pl.BlockSpec((tr, tc), lambda i, j: (i, j))

    # Pass 1: fused |w| / nonzero-mask / +inf substitution (single roofline read of W).
    masked = pl.pallas_call(
        _prep_kernel,
        out_shape=jax.ShapeDtypeStruct((rp, cp), jnp.float32),
        grid=grid,
        in_specs=[tile_spec],
        out_specs=tile_spec,
        compiler_params=elem_params,
    )(wp)

    # Threshold = n_prune-th smallest nonzero magnitude. Any padded entries are zeros -> +inf,
    # so they never displace real nonzeros and no slice-back is needed before top_k.
    if n_prune > 0:
        neg_top, _ = lax.top_k(-masked.reshape(-1), n_prune)
        thresh = -neg_top[n_prune - 1]
    else:
        thresh = jnp.float32(-jnp.inf)              # prune nothing
    thresh = thresh.reshape(1).astype(jnp.float32)
    # TODO(synk): lax.top_k with k = 5% of the weight count is still sort-class on very large
    # layers; an exact-count TPU-native alternative (bitwise radix select) needs scatter-free
    # histograms costing O(bins) VPU compares per element, so it is deferred. Ties at the
    # k-th magnitude prune all tied entries (argpartition breaks ties arbitrarily); identical
    # behaviour for the distinct-magnitude uniform init used here.

    # Pass 2: tiled threshold mask.
    # TODO(synk): with input_output_aliases on this call W could be pruned in place
    # (production path); the demo keeps a separate buffer because it checks against the old W.
    pruned = pl.pallas_call(
        _prune_kernel,
        out_shape=jax.ShapeDtypeStruct((rp, cp), w.dtype),
        grid=grid,
        in_specs=[
            pl.BlockSpec(memory_space=pltpu.MemorySpace.SMEM),    # scalar threshold
            tile_spec,
        ],
        out_specs=tile_spec,
        compiler_params=elem_params,
    )(thresh, wp)

    if (rp, cp) != (out_f, in_f):
        pruned = pruned[:out_f, :in_f]
    return pruned


def pruner_forward(x, w, b, k=0.05):
    """Pruner.forward: run the wrapped SparseLayer, then fire the pruning hook."""
    out = sparse_layer_forward(x, w, b)   # hook fires AFTER forward -> output uses old weights
    new_w = prune_weights(w, k)           # side effect of _pruning_hook, returned functionally
    return out, new_w


# ------------------------- demo / self-test -------------------------

if __name__ == "__main__":
    key = jax.random.PRNGKey(0)
    k_w, k_b, k_x = jax.random.split(key, 3)

    batch, in_features, out_features = 16, 256, 128
    k_frac = 0.05

    # SparseLayer.__init__: weight ~ U(-1, 1), entries with |w| <= 0.2 set to 0; bias ~ U(0, 1)
    w = jax.random.uniform(k_w, (out_features, in_features),
                           minval=-1.0, maxval=1.0, dtype=jnp.float32)
    w = jnp.where(jnp.abs(w) <= 0.2, 0.0, w)
    b = jax.random.uniform(k_b, (out_features,), dtype=jnp.float32)
    x = jax.random.uniform(k_x, (batch, in_features),
                           minval=-1.0, maxval=1.0, dtype=jnp.float32)

    out, pruned_w = pruner_forward(x, w, b, k=k_frac)
    out = jax.block_until_ready(out)
    pruned_w = jax.block_until_ready(pruned_w)

    # lightweight reference check (plain JAX)
    ref_out = jnp.dot(x, w.T, precision=lax.Precision.HIGHEST) + b[None, :]
    assert jnp.allclose(out, ref_out, atol=1e-3, rtol=1e-3), "forward mismatch"

    n_prune = math.floor(k_frac * in_features * out_features)
    n_before = int(jnp.sum(w != 0))
    n_after = int(jnp.sum(pruned_w != 0))
    assert n_before - n_after == n_prune, "prune count mismatch"
    # surviving entries must be unchanged
    assert bool(jnp.all(jnp.where(pruned_w != 0, pruned_w == w, True))), "prune altered values"

    print("KERNEL_OK")
</pallas_src>

<mosaic_0001>
module attributes {stable_mosaic.version = 11 : i64} {
  func.func @_linear_kernel_fused(%arg0: i32, %arg1: i32, %arg2: i32, %arg3: memref<8x256xf32, #tpu.memory_space<vmem>>, %arg4: memref<128x256xf32, #tpu.memory_space<vmem>>, %arg5: memref<1x128xf32, #tpu.memory_space<vmem>>, %arg6: memref<8x128xf32, #tpu.memory_space<vmem>>) attributes {dimension_semantics = [#tpu.dimension_semantics<parallel>, #tpu.dimension_semantics<parallel>, #tpu.dimension_semantics<arbitrary>], iteration_bounds = array<i64: 2, 1, 1>, scalar_prefetch = 0 : i64, scratch_operands = 0 : i64, tpu.core_type = #tpu.core_type<tc>, window_params = [{transform_indices = @transform_0, window_bounds = array<i64: 8, 256>}, {transform_indices = @transform_1, window_bounds = array<i64: 128, 256>}, {transform_indices = @transform_2, window_bounds = array<i64: 1, 128>}, {transform_indices = @transform_3, window_bounds = array<i64: 8, 128>}]} {
    %c0 = arith.constant 0 : index
    %c0_0 = arith.constant 0 : index
    %0 = vector.load %arg3[%c0, %c0_0] : memref<8x256xf32, #tpu.memory_space<vmem>>, vector<8x256xf32>
    %c0_1 = arith.constant 0 : index
    %c0_2 = arith.constant 0 : index
    %1 = vector.load %arg4[%c0_1, %c0_2] : memref<128x256xf32, #tpu.memory_space<vmem>>, vector<128x256xf32>
    %cst = arith.constant dense<0.000000e+00> : vector<8x128xf32>
    %2 = tpu.matmul %0, %1, %cst {dimension_numbers = #tpu.dot_dimension_numbers<[1], [1], [0], [0], [0, 0, 1, 0], [], []>} : vector<8x256xf32>, vector<128x256xf32>, vector<8x128xf32> -> vector<8x128xf32>
    %c0_i32 = arith.constant 0 : i32
    %3 = arith.cmpi eq, %arg2, %c0_i32 : i32
    %4 = arith.extui %3 : i1 to i32
    %c0_i32_3 = arith.constant 0 : i32
    %5 = arith.cmpi ne, %4, %c0_i32_3 : i32
    scf.if %5 {
      %c0_6 = arith.constant 0 : index
      %c0_7 = arith.constant 0 : index
      %9 = vector.load %arg5[%c0_6, %c0_7] : memref<1x128xf32, #tpu.memory_space<vmem>>, vector<1x128xf32>
      %10 = vector.broadcast %9 : vector<1x128xf32> to vector<8x128xf32>
      %11 = arith.addf %2, %10 : vector<8x128xf32>
      %c0_8 = arith.constant 0 : index
      %c0_9 = arith.constant 0 : index
      %12 = vector.load %arg6[%c0_8, %c0_9] : memref<8x128xf32, #tpu.memory_space<vmem>>, vector<8x128xf32>
      tpu.vector_store %arg6[%c0_8, %c0_9], %11 {strides = array<i32>} : memref<8x128xf32, #tpu.memory_space<vmem>>, vector<8x128xf32>,
    } else {
    }
    %c0_i32_4 = arith.constant 0 : i32
    %6 = arith.cmpi ne, %arg2, %c0_i32_4 : i32
    %7 = arith.extui %6 : i1 to i32
    %c0_i32_5 = arith.constant 0 : i32
    %8 = arith.cmpi ne, %7, %c0_i32_5 : i32
    scf.if %8 {
      %c0_6 = arith.constant 0 : index
      %c0_7 = arith.constant 0 : index
      %9 = vector.load %arg6[%c0_6, %c0_7] : memref<8x128xf32, #tpu.memory_space<vmem>>, vector<8x128xf32>
      %10 = arith.addf %9, %2 : vector<8x128xf32>
      %c0_8 = arith.constant 0 : index
      %c0_9 = arith.constant 0 : index
      %11 = vector.load %arg6[%c0_8, %c0_9] : memref<8x128xf32, #tpu.memory_space<vmem>>, vector<8x128xf32>
      tpu.vector_store %arg6[%c0_8, %c0_9], %10 {strides = array<i32>} : memref<8x128xf32, #tpu.memory_space<vmem>>, vector<8x128xf32>,
    } else {
    }
    return
  }
  func.func @transform_0(%arg0: i32, %arg1: i32, %arg2: i32) -> (i32, i32) {
    %c0_i32 = arith.constant 0 : i32
    return %arg0, %arg2 : i32, i32
  }
  func.func @transform_1(%arg0: i32, %arg1: i32, %arg2: i32) -> (i32, i32) {
    %c0_i32 = arith.constant 0 : i32
    return %arg1, %arg2 : i32, i32
  }
  func.func @transform_2(%arg0: i32, %arg1: i32, %arg2: i32) -> (i32, i32) {
    %c0_i32 = arith.constant 0 : i32
    %c0_i32_0 = arith.constant 0 : i32
    return %c0_i32, %arg1 : i32, i32
  }
  func.func @transform_3(%arg0: i32, %arg1: i32, %arg2: i32) -> (i32, i32) {
    %c0_i32 = arith.constant 0 : i32
    return %arg0, %arg1 : i32, i32
  }
}

</mosaic_0001>

<bundles_post_ra>
// kernel: tpu_custom_call.1
= control target key start
LH: loop header
LB: loop body
LE: loop exit
PB: predicated region body
PF: predicated region fallthrough
CT: control target
= control target key end

     0   :  { %8 = vsyncpa [#allocation3], 0  ;;  %s897_s0 = inlined_call_operand.hbm [shape: f32[16,256], index: 0, kind: input, shape index: {}]   ;;  %s898_s1 = inlined_call_operand.hbm [shape: f32[128,256], index: 1, kind: input, shape index: {}]   ;;  %s899_s2 = inlined_call_operand.vmem [shape: f32[1,128], index: 2, kind: input, shape index: {}]   ;;  %s900_s3 = inlined_call_operand.hbm [shape: f32[16,128], index: 3, kind: output, shape index: {}]  }
   0x1   :  { %10 = vsyncpa [#allocation3 + $0x1], 0 }
   0x2   :  { %11 = vsyncpa [#allocation6], 0 }
   0x3   :  { %12 = vsyncpa [#allocation4], 0 }
   0x4   :  { %14 = vsyncpa [#allocation4 + $0x1], 0  ;;  %s746_s12 = smov 0   ;;  %s748_s13 = smov 0  }
   0x5   :  { %s750_s14 = smov 0   ;;  %s752_s15 = smov 0  }
   0x6   :  { %s754_s16 = smov 0   ;;  %s756_s17 = smov 0  }
   0x7 LB: > { %s481_s18 = sadd.s32 4294967295, %s721_s17   ;;  %p483_p0 = scmp.ge.s32.totalorder %s721_s17, 1  ;;  %s721_s17 = sphi %s756_s17, %s20_s17   ;;  %s717_s16 = sphi %s754_s16, %s911_s16   ;;  %s713_s15 = sphi %s752_s15, %s910_s15   ;;  %s709_s14 = sphi %s750_s14, %s909_s14   ;;  %s705_s13 = sphi %s748_s13, %s908_s13   ;;  %s701_s12 = sphi %s746_s12, %s907_s12  }
   0x8   : > { %p778_p1 = scmp.eq.s32.totalorder %s481_s18, 0  ;;  %p154_p2 = scmp.lt.s32.totalorder %s721_s17, 3 }
   0x9   : > { %s171_s22 = sshll.u32 %s898_s1, 4  ;;  %s723_s24 = smov [#allocation5]   ;;  %s172_s22 = int_to_ptr.hbm [resolvable:$true] %s171_s22 }
   0xa   : > { %p786_p3 = pnand %p483_p0, %p154_p2  ;;  %s173_s25 = sshll.u32 %s723_s24, 4  ;;  %s174_s25 = int_to_ptr.vmem [resolvable:$true] %s173_s25 }
   0xb   : > { %p486_p6 = scmp.ge.s32.totalorder %s721_s17, 2  ;;  %s724_s26 = smov 256  }
   0xc   : > { %p507_p4 = pneg %p786_p3  ;;  %s725_s27 = smov 16  }
   0xd   : > { %s482_s28 = sadd.s32 4294967294, %s721_s17   ;;  %s39_s29 = sadd.s32 1, %s717_s16 }
   0xe   : > { %p508_p5 = pnand %p507_p4, %p778_p1  ;;  %s48_s30 = sadd.s32 1, %s709_s14 }
   0xf   : > { %p41_p7 = scmp.ge.s32.totalorder %s39_s29, 2  ;;  %p55_p8 = scmp.ne.s32.totalorder %s709_s14, %s705_s13 }
  0x10   : > { %510 = dma.hbm_to_vmem [thread:$0]  (!%p508_p5), %s172_s22, 4096, %s174_s25, [#allocation6], %s724_s26, %s724_s26, %s725_s27  }
  0x11   : > { %p56_p9 = scmp.eq.s32.totalorder %s721_s17, 0  ;;  %p61_p10 = scmp.ne.s32.totalorder %s705_s13, %s701_s12 }
  0x12   : > { %s913_s29 = smov (%p41_p7, %s39_s29), 0  ;;  %p141_p13 = scmp.eq.s32.totalorder %s481_s18, 1 }
  0x13   : > { %p805_p11 = por %p56_p9, %p55_p8  ;;  %p811_p12 = por %p778_p1, %p61_p10 }
  0x14   : > { %s43_s6 = ssub.s32 %s717_s16, %s913_s29  ;;  %p147_p2 = scmp.eq.s32.totalorder %s482_s28, 1 }
  0x15   : > { %p46_p0 = scmp.eq.s32.totalorder %s43_s6, 0  ;;  %p817_p4 = por %p141_p13, %p55_p8 }
  0x16   : > { %p520_p5 = scmp.lt.s32.totalorder %s721_s17, 2  ;;  %p825_p7 = por %p147_p2, %p61_p10 }
  0x17   : > { %s823_s8 = scalar_select %p46_p0, %s709_s14, %s48_s30  }
  0x18   : > { %s193_s10 = sand.u32 1, %s709_s14   ;;  %s498_s20 = sshll.u32 %s717_s16, 4 }
  0x19   : > { %s487_s11 = sshll.u32 %s193_s10, 4  ;;  %s204_s18 = scalar_lea.hbm %s897_s0, %s498_s20 }
  0x1a   : > { %s197_s24 = scalar_lea.vmem [#allocation2], %s487_s11  ;;  %s206_s26 = sshll.u32 %s204_s18, 4  ;;  %s207_s26 = int_to_ptr.hbm [resolvable:$true] %s206_s26 }
  0x1b   : > { %s208_s25 = sshll.u32 %s197_s24, 4  ;;  %p512_p8 = pnand %p520_p5, %p805_p11  ;;  %s209_s25 = int_to_ptr.vmem [resolvable:$true] %s208_s25 }
  0x1c   : > { %s194_s27 = scalar_lea.sflag [#allocation3], %s193_s10  ;;  %217 = sbr.rel (%p786_p3) target bundleno = 233 (0xe9), region = 32 }
  0x1d   : > { %514 = dma.hbm_to_vmem [thread:$0]  (!%p512_p8), %s207_s26, 256, %s209_s25, %s194_s27  }
  0x1e   : > { %s839_s28 = sand.u32 (!%p786_p3), 1, %s705_s13  }
  0x1f   : > { %s491_s30 = sshll.u32 (!%p786_p3), %s839_s28, 4  ;;  %s220_s6 = scalar_lea.sflag (!%p786_p3), [#allocation3], %s839_s28 }
  0x20   : > { %s843_s11 = scalar_lea.vmem (!%p786_p3), [#allocation2], %s491_s30 }
  0x21   : > { %688 = dma.done.wait (%p811_p12), %s220_s6, 256  }
  0x22   : > { %690 = vsyncadd (%p811_p12), %s220_s6, 4294967040 }
  0x23   : > { %692 = dma.done.wait (%p778_p1), [#allocation6], 4096  }
  0x24   : > { %694 = vsyncadd (%p778_p1), [#allocation6], 4294963200  ;;  %v293_v0 = vld [vmem:[#allocation5 + $0xf0] sm:$0xff]  ;;  %v294_v1 = vld [vmem:[#allocation5 + $0xf8] sm:$0xff]  ;;  %s493_s19 = sshll.u32 %s839_s28, 3  ;;  %s495_s23 = sshll.u32 %s713_s15, 3 }
  0x25   : > { %295 = vmatpush.xpose.msra.mxu0 %v293_v0  ;;  %315 = vmatpush.xpose.msra.mxu1 %v294_v1  ;;  %v291_v2 = vld [vmem:[#allocation5 + $0xe0] sm:$0xff]  ;;  %v292_v3 = vld [vmem:[#allocation5 + $0xe8] sm:$0xff]  ;;  %v289_v4 = vld [vmem:[#allocation5 + $0xd0] sm:$0xff]  ;;  %s364_s10 = scalar_lea.hbm %s900_s3, %s495_s23  ;;  %s254_s22 = scalar_lea.vmem [#allocation7], %s493_s19 }
  0x26   : > { %v290_v5 = vld [vmem:[#allocation5 + $0xd8] sm:$0xff]  ;;  %v287_v6 = vld [vmem:[#allocation5 + $0xc0] sm:$0xff]  ;;  %v288_v7 = vld [vmem:[#allocation5 + $0xc8] sm:$0xff]  ;;  %s366_s18 = sshll.u32 %s254_s22, 4  ;;  %s368_s24 = sshll.u32 %s364_s10, 4  ;;  %s367_s18 = int_to_ptr.vmem [resolvable:$true] %s366_s18  ;;  %s369_s24 = int_to_ptr.hbm [resolvable:$true] %s368_s24 }
  0x27   : > { %v285_v8 = vld [vmem:[#allocation5 + $0xb0] sm:$0xff]  ;;  %v286_v9 = vld [vmem:[#allocation5 + $0xb8] sm:$0xff]  ;;  %v283_v10 = vld [vmem:[#allocation5 + $0xa0] sm:$0xff]  ;;  %s353_s15 = scalar_lea.sflag [#allocation4], %s839_s28  ;;  %s649_s25 = sshra.s32 %s369_s24, 4  ;;  %s650_s25 = int_to_ptr.hbm [resolvable:$true] %s649_s25 }
  0x28   : > { %v284_v11 = vld [vmem:[#allocation5 + $0xa8] sm:$0xff]  ;;  %v281_v12 = vld [vmem:[#allocation5 + $0x90] sm:$0xff]  ;;  %v282_v13 = vld [vmem:[#allocation5 + $0x98] sm:$0xff]  ;;  %s651_s26 = scalar_lea.hbm %s650_s25, 8  ;;  %s655_s6 = scalar_lea.hbm %s900_s3, 16 }
  0x29   : > { %296 = vmatpush.xpose.msra.mxu0 %v291_v2  ;;  %316 = vmatpush.xpose.msra.mxu1 %v292_v3  ;;  %v279_v14 = vld [vmem:[#allocation5 + $0x80] sm:$0xff]  ;;  %v280_v15 = vld [vmem:[#allocation5 + $0x88] sm:$0xff]  ;;  %v277_v16 = vld [vmem:[#allocation5 + $0x70] sm:$0xff]  ;;  %p652_p1 = scmp.ne.s32.totalorder %s650_s25, %s651_s26  ;;  %p656_p10 = scmp.lt.s32.totalorder %s650_s25, %s900_s3 }
  0x2a   : > { %v278_v17 = vld [vmem:[#allocation5 + $0x78] sm:$0xff]  ;;  %v275_v18 = vld [vmem:[#allocation5 + $0x60] sm:$0xff]  ;;  %v276_v19 = vld [vmem:[#allocation5 + $0x68] sm:$0xff]  ;;  %p657_p11 = scmp.lt.s32.totalorder %s655_s6, %s651_s26 }
  0x2b   : > { %v273_v20 = vld [vmem:[#allocation5 + $0x50] sm:$0xff]  ;;  %v274_v21 = vld [vmem:[#allocation5 + $0x58] sm:$0xff]  ;;  %v271_v22 = vld [vmem:[#allocation5 + $0x40] sm:$0xff]  ;;  %p653_p3 = pnand %p652_p1, %p817_p4 }
  0x2c   : > { %v272_v23 = vld [vmem:[#allocation5 + $0x48] sm:$0xff]  ;;  %v269_v24 = vld [vmem:[#allocation5 + $0x30] sm:$0xff]  ;;  %v270_v25 = vld [vmem:[#allocation5 + $0x38] sm:$0xff]  ;;  %p658_p12 = por %p657_p11, %p656_p10 }
  0x2d   : > { %297 = vmatpush.xpose.msra.mxu0 %v289_v4  ;;  %317 = vmatpush.xpose.msra.mxu1 %v290_v5  ;;  %v267_v26 = vld [vmem:[#allocation5 + $0x20] sm:$0xff]  ;;  %v268_v27 = vld [vmem:[#allocation5 + $0x28] sm:$0xff]  ;;  %v265_v28 = vld [vmem:[#allocation5 + $0x10] sm:$0xff]  ;;  %p654_p9 = pneg %p653_p3 }
  0x2e   : > { %v266_v29 = vld [vmem:[#allocation5 + $0x18] sm:$0xff]  ;;  %v263_v30 = vld [vmem:[#allocation5] sm:$0xff]  ;;  %v264_v31 = vld [vmem:[#allocation5 + $0x8] sm:$0xff] }
  0x2f   : > { %v261_v32 = vld [vmem:[%s843_s11] sm:$0xff]  ;;  %v262_v33 = vld [vmem:[%s843_s11 + $0x8] sm:$0xff]  ;;  %p659_p13 = pnand %p658_p12, %p654_p9 }
  0x30   : > { %v574_v34 = vld [vmem:[%s899_s2] ss:$0 sm:$0xff] }
  0x31   : > { %298 = vmatpush.xpose.msra.mxu0 %v287_v6  ;;  %318 = vmatpush.xpose.msra.mxu1 %v288_v7 }
  0x35   : > { %299 = vmatpush.xpose.msra.mxu0 %v285_v8  ;;  %319 = vmatpush.xpose.msra.mxu1 %v286_v9 }
  0x39   : > { %300 = vmatpush.xpose.msra.mxu0 %v283_v10  ;;  %320 = vmatpush.xpose.msra.mxu1 %v284_v11 }
  0x3d   : > { %301 = vmatpush.xpose.msra.mxu0 %v281_v12  ;;  %321 = vmatpush.xpose.msra.mxu1 %v282_v13 }
  0x41   : > { %302 = vmatpush.xpose.msra.mxu0 %v279_v14  ;;  %322 = vmatpush.xpose.msra.mxu1 %v280_v15 }
  0x45   : > { %303 = vmatpush.xpose.msra.mxu0 %v277_v16  ;;  %323 = vmatpush.xpose.msra.mxu1 %v278_v17 }
  0x49   : > { %304 = vmatpush.xpose.msra.mxu0 %v275_v18  ;;  %324 = vmatpush.xpose.msra.mxu1 %v276_v19 }
  0x4d   : > { %305 = vmatpush.xpose.msra.mxu0 %v273_v20  ;;  %325 = vmatpush.xpose.msra.mxu1 %v274_v21 }
  0x51   : > { %306 = vmatpush.xpose.msra.mxu0 %v271_v22  ;;  %326 = vmatpush.xpose.msra.mxu1 %v272_v23 }
  0x55   : > { %307 = vmatpush.xpose.msra.mxu0 %v269_v24  ;;  %327 = vmatpush.xpose.msra.mxu1 %v270_v25 }
  0x59   : > { %308 = vmatpush.xpose.msra.mxu0 %v267_v26  ;;  %328 = vmatpush.xpose.msra.mxu1 %v268_v27 }
  0x5d   : > { %309 = vmatpush.xpose.msra.mxu0 %v265_v28  ;;  %329 = vmatpush.xpose.msra.mxu1 %v266_v29 }
  0x61   : > { %310 = vmatpush.xpose.msra.mxu0 %v263_v30  ;;  %330 = vmatpush.xpose.msra.mxu1 %v264_v31 }
  0x64   : > { %311 = vmatmul.f32.vlgmr.msra.gmra.mxu0 %v261_v32  ;;  %331 = vmatmul.f32.vlgmr.msra.gmra.mxu1 %v262_v33 }
  0xe1   : > { %v312_v35 = vpop.f32.mrf.mxu0  ;;  %v332_v36 = vpop.f32.mrf.mxu1 }
  0xe2   : > { %v333_v37 = vadd.f32 %v332_v36, %v312_v35 }
  0xe4   : > { %v343_v38 = vadd.f32 %v574_v34, %v333_v37 }
  0xe6   : > { %344 = vst [vmem:[%s254_s22] sm:$0xff] %v343_v38 }
  0xe7   : > { %662 = shalt.err (!%p659_p13)
}
  0xe8   : > { %505 = dma.vmem_to_hbm [thread:$0]  (%p817_p4), %s367_s18, 128, %s369_s24, %s353_s15  }
  0xe9 PF: > { %s380_s28 = sand.u32 1, %s701_s12   ;;  %p516_p0 = pnand %p486_p6, %p825_p7 }
  0xea   : > { %s381_s23 = scalar_lea.sflag [#allocation4], %s380_s28 }
  0xeb   : > { %p517_p2 = pneg %p516_p0 }
  0xed   : > { %696 = dma.done.wait (%p517_p2), %s381_s23, 128  }
  0xee   : > { %698 = vsyncadd (%p517_p2), %s381_s23, 4294967168  ;;  %s20_s17 = sadd.s32 1, %s721_s17   ;;  %s907_s12 = smov %s705_s13 }
  0xef   : > { %p17_p5 = scmp.ge.s32.totalorder %s20_s17, 4   ;;  %s908_s13 = smov %s709_s14 }
  0xf0   : > { %s909_s14 = smov %s823_s8  ;;  %s910_s15 = smov %s717_s16 }
  0xf1   : > { %s911_s16 = smov %s913_s29  ;;  %19 = sbr.rel (!%p17_p5) target bundleno = 7 (0x7), region = 93 }
  0xf6   :  { %387 = vsyncpa [#allocation3], 1 }
  0xf7   :  { %389 = vsyncpa [#allocation3 + $0x1], 1 }
  0xf8   :  { %390 = vsyncpa [#allocation6], 1 }
  0xf9   :  { %391 = vsyncpa [#allocation4], 1 }
  0xfa   :  { %393 = vsyncpa [#allocation4 + $0x1], 1 }

</bundles_post_ra>
